<compile_context>
chip_gen: v7x
topology: tpu7x:2x2x1
jax: 0.10.0
libtpu: 0.0.40
codegen_flags: <defaults>
</compile_context>

<pallas_src>
import functools

import jax
import jax.numpy as jnp
from jax import lax
from jax.experimental import pallas as pl
from jax.experimental.pallas import tpu as pltpu

LN_EPS = 1e-5  # torch.nn.LayerNorm default


def conv_relu_norm_kernel(x_ref, halo_ref, w_ref, bias_ref, gamma_ref, beta_ref,
                          out_ref, *, kernel_size, pad, t_tile):
    """One (batch b, time-tile t) grid step.

    x_ref    : (1, C_in, t_tile)     center tile, time on lanes
    halo_ref : (1, 1, 2*pad, C_in)   rows [0,pad)=cols t0-pad..t0-1, rows [pad,2p)=cols t0+t_tile..
                                     (zeros at sequence edges == Conv1d zero padding)
    w_ref    : (K, C_out, C_in)      conv taps
    bias_ref : (1, C_out, 1)         conv bias + folded speaker bias for this batch
    gamma_ref: (C_out, 1)            LayerNorm scale
    beta_ref : (C_out, 1)            LayerNorm shift
    out_ref  : (1, C_out, t_tile)    channel-major output tile (lane-dense store)
    """
    x = x_ref[0]                                                   # (C_in, t_tile)

    # Center tap.
    acc = lax.dot_general(w_ref[pad], x, (((1,), (0,)), ((), ())),
                          preferred_element_type=jnp.float32)      # (C_out, t_tile)

    # Remaining taps: acc[:, t] += W_k @ x[:, t + (k - pad)], in-tile part only.
    # Lane shift via pltpu.roll (XLU) + zero-mask of the wrapped columns (VPU);
    # the masked-out columns are supplied by the halo corrections below.
    if kernel_size > 1:
        lane_in = lax.broadcasted_iota(jnp.int32, x.shape, 1)
        zero = jnp.zeros((), x.dtype)
        for k in range(kernel_size):
            d = k - pad
            if d == 0:
                continue
            rolled = pltpu.roll(x, shift=(-d) % t_tile, axis=1)    # [:, t] = x[:, (t+d) % t_tile]
            if d > 0:
                xs = jnp.where(lane_in < t_tile - d, rolled, zero)
            else:
                xs = jnp.where(lane_in >= -d, rolled, zero)
            acc = acc + lax.dot_general(w_ref[k], xs, (((1,), (0,)), ((), ())),
                                        preferred_element_type=jnp.float32)

    # Cross-tile / sequence-edge halo corrections (only the first/last `pad`
    # output columns are touched; pad*(pad+1)/2 masked matvecs per side).
    if pad > 0:
        halo = halo_ref[0, 0]                                      # (2*pad, C_in)
        out_lane = lax.broadcasted_iota(jnp.int32, (1, t_tile), 1)

        def edge(acc, tap, row, out_col):
            prod = (w_ref[tap].astype(jnp.float32) *
                    halo[row:row + 1, :].astype(jnp.float32))      # (C_out, C_in)
            c = jnp.sum(prod, axis=1, keepdims=True)               # (C_out, 1)
            return acc + jnp.where(out_lane == out_col, c, 0.0)

        for tl in range(pad):                     # left edge: t + k - pad < 0
            for k in range(pad - tl):
                acc = edge(acc, k, tl + k, tl)
        for k in range(pad + 1, kernel_size):     # right edge: t + k - pad >= t_tile
            for tl in range(t_tile - (k - pad), t_tile):
                acc = edge(acc, k, pad + tl + k - pad - t_tile, tl)

    # Bias (+ folded speaker bias) and ReLU.
    acc = jnp.maximum(acc + bias_ref[0], 0.0)                      # (C_out, t_tile)

    # LayerNorm over channels (sublane axis), two-pass (centered) stats in f32.
    mean = jnp.mean(acc, axis=0, keepdims=True)                    # (1, t_tile)
    centered = acc - mean
    var = jnp.mean(centered * centered, axis=0, keepdims=True)
    y = centered * lax.rsqrt(var + LN_EPS)
    y = y * gamma_ref[...] + beta_ref[...]

    out_ref[0] = y.astype(out_ref.dtype)


def conv_relu_norm(signal, spkr_vec, params, *, kernel_size):
    """signal: (B, C_in, T) NCT; spkr_vec: (B, 1, E) or None. Returns (B, C_out, T).

    Matches ConvReLUNorm.forward; dropout (p=0.0 / eval mode) is the identity and
    spkr_vec is passed through unchanged by the module, so neither needs kernel work.
    """
    wconv = params["wconv"]      # (C_out, C_in, K)  -- PyTorch Conv1d layout
    bconv = params["bconv"]      # (C_out,)
    wspkr = params["wspkr"]      # (C_out, E)        -- PyTorch Linear layout
    gamma = params["gamma"]      # (C_out,)
    beta = params["beta"]        # (C_out,)

    if kernel_size % 2 != 1:
        # Conv1d(padding=K//2) with even K changes the output length (T+1).
        raise NotImplementedError("only odd kernel_size is supported")

    B, C_in, T = signal.shape
    C_out = wconv.shape[0]
    pad = kernel_size // 2
    dt = signal.dtype
    itemsize = jnp.dtype(dt).itemsize

    # Keep stores lane-dense: pad T up to a multiple of 128 only if needed
    # (the zero columns reproduce the right-edge zero padding; extra outputs are
    # sliced away). The common multiple-of-128 case has NO input staging copy.
    T_pad = ((T + 127) // 128) * 128
    x = signal if T_pad == T else jnp.pad(signal, ((0, 0), (0, 0), (0, T_pad - T)))

    # VMEM budget: never above 0.8x physical (v7x: 64 MiB, v5e/v6e: 128 MiB).
    try:
        vmem_cap = int(pltpu.get_tpu_info().vmem_capacity_bytes)
    except Exception:
        vmem_cap = 64 << 20
    vmem_budget = int(0.8 * vmem_cap)

    def vmem_est(tt):
        return ((2 * C_in * tt + 2 * C_out * tt) * itemsize          # x/out double-buffered
                + 2 * 8 * 128 * itemsize                             # halo block (layout-padded)
                + 2 * (kernel_size * C_out * C_in * itemsize + 3 * C_out * 4)
                + (C_in + 3 * C_out) * tt * 4                        # rolled tap + f32 acc/centered/y
                + (2 << 20))                                         # headroom

    t_tile = 128
    for cand in (1024, 512, 256, 128):
        if T_pad % cand == 0 and vmem_est(cand) <= vmem_budget // 2:
            t_tile = cand
            break
    num_t = T_pad // t_tile

    # Conv taps (K, C_out, C_in) in the signal dtype (bf16 models get bf16 MXU
    # inputs); accumulation stays f32 inside the kernel.
    w_taps = jnp.transpose(wconv, (2, 0, 1)).astype(dt)

    # Fold the speaker bias (Linear(E->C_out, no bias), constant over time) into
    # the conv bias once per batch element.
    if spkr_vec is None:
        bias_total = jnp.broadcast_to(bconv[None, :], (B, C_out))
    else:
        bias_total = bconv[None, :] + jnp.einsum("bse,ce->bc", spkr_vec, wspkr)
    bias_total = bias_total.reshape(B, C_out, 1).astype(jnp.float32)

    gamma2 = gamma.reshape(C_out, 1).astype(jnp.float32)
    beta2 = beta.reshape(C_out, 1).astype(jnp.float32)

    # Tiny cross-tile halo side array (B, num_t, 2*pad, C_in) built from strided
    # slices of x (no full staging copy); zeros at the sequence edges.
    if pad > 0:
        x_r = x.reshape(B, C_in, num_t, t_tile)
        zero_edge = jnp.zeros((B, C_in, 1, pad), dt)
        left = jnp.concatenate([zero_edge, x_r[:, :, :-1, t_tile - pad:]], axis=2)
        right = jnp.concatenate([x_r[:, :, 1:, :pad], zero_edge], axis=2)
        halo = jnp.transpose(jnp.concatenate([left, right], axis=3), (0, 2, 3, 1))
    else:
        halo = jnp.zeros((B, num_t, 1, C_in), dt)   # unused dummy for K == 1
    halo_rows = halo.shape[2]

    vmem_limit = int(min(max(vmem_est(t_tile), 32 << 20), vmem_budget))

    kernel = functools.partial(conv_relu_norm_kernel, kernel_size=kernel_size,
                               pad=pad, t_tile=t_tile)

    out = pl.pallas_call(
        kernel,
        out_shape=jax.ShapeDtypeStruct((B, C_out, T_pad), dt),
        grid_spec=pltpu.PrefetchScalarGridSpec(
            num_scalar_prefetch=0,
            grid=(B, num_t),
            in_specs=[
                pl.BlockSpec((1, C_in, t_tile), lambda b, t: (b, 0, t)),
                pl.BlockSpec((1, 1, halo_rows, C_in), lambda b, t: (b, t, 0, 0)),
                pl.BlockSpec((kernel_size, C_out, C_in), lambda b, t: (0, 0, 0)),
                pl.BlockSpec((1, C_out, 1), lambda b, t: (b, 0, 0)),
                pl.BlockSpec((C_out, 1), lambda b, t: (0, 0)),
                pl.BlockSpec((C_out, 1), lambda b, t: (0, 0)),
            ],
            out_specs=pl.BlockSpec((1, C_out, t_tile), lambda b, t: (b, 0, t)),
        ),
        compiler_params=pltpu.CompilerParams(
            # No state carried across grid steps -> both axes can feed both
            # v7x TensorCores.
            dimension_semantics=("parallel", "parallel"),
            vmem_limit_bytes=vmem_limit,
        ),
    )(x, halo, w_taps, bias_total, gamma2, beta2)

    if T_pad != T:
        out = out[:, :, :T]
    # TODO(synk): dropout (p=0.0 / eval mode) is the identity, so it is omitted;
    # spkr_vec is returned unchanged by the module and is not touched here.
    return out


def reference(signal, spkr_vec, params, *, kernel_size):
    """Pure-JAX reference mirroring the PyTorch forward (NCT in / NCT out)."""
    wconv, bconv, wspkr, gamma, beta = (
        params["wconv"], params["bconv"], params["wspkr"],
        params["gamma"], params["beta"])
    pad = kernel_size // 2
    conv = lax.conv_general_dilated(
        signal, wconv, window_strides=(1,), padding=[(pad, pad)],
        dimension_numbers=("NCH", "OIH", "NCH"))
    conv = conv + bconv[None, :, None]
    if spkr_vec is not None:
        conv = conv + jnp.einsum("bse,ce->bc", spkr_vec, wspkr)[:, :, None]
    out = jax.nn.relu(conv)
    mean = jnp.mean(out, axis=1, keepdims=True)
    var = jnp.mean((out - mean) ** 2, axis=1, keepdims=True)
    out = (out - mean) * lax.rsqrt(var + LN_EPS)
    return out * gamma[None, :, None] + beta[None, :, None]


if __name__ == "__main__":
    # Small shapes consistent with the module; T = 3 * 128 exercises the
    # time-tiling + halo-correction path (grid = (2, 3)).
    B, C_IN, C_OUT, T = 2, 16, 16, 384
    K, E = 3, 64

    key = jax.random.PRNGKey(0)
    ks = jax.random.split(key, 7)

    signal = jax.random.normal(ks[0], (B, C_IN, T), jnp.float32)      # NCT
    spkr_vec = jax.random.normal(ks[1], (B, 1, E), jnp.float32)

    params = {
        # PyTorch layouts: Conv1d weight (C_out, C_in, K), Linear weight (C_out, E).
        "wconv": jax.random.normal(ks[2], (C_OUT, C_IN, K), jnp.float32) * 0.2,
        "bconv": jax.random.normal(ks[3], (C_OUT,), jnp.float32) * 0.1,
        "wspkr": jax.random.normal(ks[4], (C_OUT, E), jnp.float32) * 0.1,
        "gamma": 1.0 + 0.1 * jax.random.normal(ks[5], (C_OUT,), jnp.float32),
        "beta": 0.1 * jax.random.normal(ks[6], (C_OUT,), jnp.float32),
    }

    out = conv_relu_norm(signal, spkr_vec, params, kernel_size=K)
    out = jax.block_until_ready(out)

    ref = reference(signal, spkr_vec, params, kernel_size=K)
    assert out.shape == (B, C_OUT, T), out.shape
    max_err = float(jnp.max(jnp.abs(out - ref)))
    assert jnp.allclose(out, ref, atol=1e-4, rtol=1e-4), max_err

    print("KERNEL_OK")
</pallas_src>

<mosaic_0001>
module attributes {stable_mosaic.version = 11 : i64} {
  func.func @conv_relu_norm_kernel(%arg0: i32, %arg1: i32, %arg2: memref<1x16x128xf32, #tpu.memory_space<vmem>>, %arg3: memref<1x1x2x16xf32, #tpu.memory_space<vmem>>, %arg4: memref<3x16x16xf32, #tpu.memory_space<vmem>>, %arg5: memref<1x16x1xf32, #tpu.memory_space<vmem>>, %arg6: memref<16x1xf32, #tpu.memory_space<vmem>>, %arg7: memref<16x1xf32, #tpu.memory_space<vmem>>, %arg8: memref<1x16x128xf32, #tpu.memory_space<vmem>>) attributes {dimension_semantics = [#tpu.dimension_semantics<parallel>, #tpu.dimension_semantics<parallel>], iteration_bounds = array<i64: 2, 3>, scalar_prefetch = 0 : i64, scratch_operands = 0 : i64, tpu.core_type = #tpu.core_type<tc>, window_params = [{transform_indices = @transform_0, window_bounds = array<i64: 1, 16, 128>}, {transform_indices = @transform_1, window_bounds = array<i64: 1, 1, 2, 16>}, {pipeline_mode = #tpu.pipeline_mode<synchronous>, transform_indices = @transform_2, window_bounds = array<i64: 3, 16, 16>}, {transform_indices = @transform_3, window_bounds = array<i64: 1, 16, 1>}, {pipeline_mode = #tpu.pipeline_mode<synchronous>, transform_indices = @transform_4, window_bounds = array<i64: 16, 1>}, {pipeline_mode = #tpu.pipeline_mode<synchronous>, transform_indices = @transform_5, window_bounds = array<i64: 16, 1>}, {transform_indices = @transform_6, window_bounds = array<i64: 1, 16, 128>}]} {
    %c0 = arith.constant 0 : index
    %c0_0 = arith.constant 0 : index
    %c0_1 = arith.constant 0 : index
    %0 = vector.load %arg2[%c0, %c0_0, %c0_1] : memref<1x16x128xf32, #tpu.memory_space<vmem>>, vector<1x16x128xf32>
    %1 = vector.shape_cast %0 : vector<1x16x128xf32> to vector<16x128xf32>
    %c1 = arith.constant 1 : index
    %c0_2 = arith.constant 0 : index
    %c0_3 = arith.constant 0 : index
    %2 = vector.load %arg4[%c1, %c0_2, %c0_3] : memref<3x16x16xf32, #tpu.memory_space<vmem>>, vector<1x16x16xf32>
    %3 = vector.shape_cast %2 : vector<1x16x16xf32> to vector<16x16xf32>
    %cst = arith.constant dense<0.000000e+00> : vector<16x128xf32>
    %4 = tpu.matmul %3, %1, %cst {dimension_numbers = #tpu.dot_dimension_numbers<[1], [0], [0], [1], [0, 0, 1, 1], [], []>} : vector<16x16xf32>, vector<16x128xf32>, vector<16x128xf32> -> vector<16x128xf32>
    %5 = tpu.iota {dimensions = array<i32: 1>} : vector<16x128xi32>
    %c1_i32 = arith.constant 1 : i32
    %6 = tpu.dynamic_rotate %1 by %c1_i32 dim 1 : vector<16x128xf32>, i32 -> vector<16x128xf32>
    %c1_i32_4 = arith.constant 1 : i32
    %7 = vector.broadcast %c1_i32_4 : i32 to vector<16x128xi32>
    %8 = arith.cmpi sge, %5, %7 : vector<16x128xi32>
    %cst_5 = arith.constant 0.000000e+00 : f32
    %9 = vector.broadcast %cst_5 : f32 to vector<16x128xf32>
    %10 = arith.select %8, %6, %9 : vector<16x128xi1>, vector<16x128xf32>
    %c0_6 = arith.constant 0 : index
    %c0_7 = arith.constant 0 : index
    %c0_8 = arith.constant 0 : index
    %11 = vector.load %arg4[%c0_6, %c0_7, %c0_8] : memref<3x16x16xf32, #tpu.memory_space<vmem>>, vector<1x16x16xf32>
    %12 = vector.shape_cast %11 : vector<1x16x16xf32> to vector<16x16xf32>
    %cst_9 = arith.constant dense<0.000000e+00> : vector<16x128xf32>
    %13 = tpu.matmul %12, %10, %cst_9 {dimension_numbers = #tpu.dot_dimension_numbers<[1], [0], [0], [1], [0, 0, 1, 1], [], []>} : vector<16x16xf32>, vector<16x128xf32>, vector<16x128xf32> -> vector<16x128xf32>
    %14 = arith.addf %4, %13 : vector<16x128xf32>
    %c127_i32 = arith.constant 127 : i32
    %15 = tpu.dynamic_rotate %1 by %c127_i32 dim 1 : vector<16x128xf32>, i32 -> vector<16x128xf32>
    %c127_i32_10 = arith.constant 127 : i32
    %16 = vector.broadcast %c127_i32_10 : i32 to vector<16x128xi32>
    %17 = arith.cmpi slt, %5, %16 : vector<16x128xi32>
    %cst_11 = arith.constant 0.000000e+00 : f32
    %18 = vector.broadcast %cst_11 : f32 to vector<16x128xf32>
    %19 = arith.select %17, %15, %18 : vector<16x128xi1>, vector<16x128xf32>
    %c2 = arith.constant 2 : index
    %c0_12 = arith.constant 0 : index
    %c0_13 = arith.constant 0 : index
    %20 = vector.load %arg4[%c2, %c0_12, %c0_13] : memref<3x16x16xf32, #tpu.memory_space<vmem>>, vector<1x16x16xf32>
    %21 = vector.shape_cast %20 : vector<1x16x16xf32> to vector<16x16xf32>
    %cst_14 = arith.constant dense<0.000000e+00> : vector<16x128xf32>
    %22 = tpu.matmul %21, %19, %cst_14 {dimension_numbers = #tpu.dot_dimension_numbers<[1], [0], [0], [1], [0, 0, 1, 1], [], []>} : vector<16x16xf32>, vector<16x128xf32>, vector<16x128xf32> -> vector<16x128xf32>
    %23 = arith.addf %14, %22 : vector<16x128xf32>
    %c0_15 = arith.constant 0 : index
    %c0_16 = arith.constant 0 : index
    %c0_17 = arith.constant 0 : index
    %c0_18 = arith.constant 0 : index
    %24 = vector.load %arg3[%c0_15, %c0_16, %c0_17, %c0_18] : memref<1x1x2x16xf32, #tpu.memory_space<vmem>>, vector<1x1x2x16xf32>
    %25 = vector.shape_cast %24 : vector<1x1x2x16xf32> to vector<2x16xf32>
    %26 = tpu.iota {dimensions = array<i32: 1>} : vector<1x128xi32>
    %c0_19 = arith.constant 0 : index
    %c0_20 = arith.constant 0 : index
    %c0_21 = arith.constant 0 : index
    %27 = vector.load %arg4[%c0_19, %c0_20, %c0_21] : memref<3x16x16xf32, #tpu.memory_space<vmem>>, vector<1x16x16xf32>
    %28 = vector.shape_cast %27 : vector<1x16x16xf32> to vector<16x16xf32>
    %29 = vector.extract_strided_slice %25 {offsets = [0, 0], sizes = [1, 16], strides = [1, 1]} : vector<2x16xf32> to vector<1x16xf32>
    %30 = vector.broadcast %29 : vector<1x16xf32> to vector<16x16xf32>
    %31 = arith.mulf %28, %30 : vector<16x16xf32>
    %cst_22 = arith.constant dense<0.000000e+00> : vector<16xf32>
    %32 = vector.multi_reduction <add>, %31, %cst_22 [1] : vector<16x16xf32> to vector<16xf32>
    %33 = vector.shape_cast %32 : vector<16xf32> to vector<16x1xf32>
    %c0_i32 = arith.constant 0 : i32
    %34 = vector.broadcast %c0_i32 : i32 to vector<1x128xi32>
    %35 = arith.cmpi eq, %26, %34 : vector<1x128xi32>
    %cst_23 = arith.constant 0.000000e+00 : f32
    %36 = vector.shape_cast %35 : vector<1x128xi1> to vector<1x128xi1>
    %37 = vector.broadcast %36 : vector<1x128xi1> to vector<16x128xi1>
    %38 = vector.shape_cast %33 : vector<16x1xf32> to vector<16x1xf32>
    %39 = vector.broadcast %38 : vector<16x1xf32> to vector<16x128xf32>
    %40 = vector.broadcast %cst_23 : f32 to vector<16x128xf32>
    %41 = arith.select %37, %39, %40 : vector<16x128xi1>, vector<16x128xf32>
    %42 = arith.addf %23, %41 : vector<16x128xf32>
    %c2_24 = arith.constant 2 : index
    %c0_25 = arith.constant 0 : index
    %c0_26 = arith.constant 0 : index
    %43 = vector.load %arg4[%c2_24, %c0_25, %c0_26] : memref<3x16x16xf32, #tpu.memory_space<vmem>>, vector<1x16x16xf32>
    %44 = vector.shape_cast %43 : vector<1x16x16xf32> to vector<16x16xf32>
    %45 = vector.extract_strided_slice %25 {offsets = [1, 0], sizes = [1, 16], strides = [1, 1]} : vector<2x16xf32> to vector<1x16xf32>
    %46 = vector.broadcast %45 : vector<1x16xf32> to vector<16x16xf32>
    %47 = arith.mulf %44, %46 : vector<16x16xf32>
    %cst_27 = arith.constant dense<0.000000e+00> : vector<16xf32>
    %48 = vector.multi_reduction <add>, %47, %cst_27 [1] : vector<16x16xf32> to vector<16xf32>
    %49 = vector.shape_cast %48 : vector<16xf32> to vector<16x1xf32>
    %c127_i32_28 = arith.constant 127 : i32
    %50 = vector.broadcast %c127_i32_28 : i32 to vector<1x128xi32>
    %51 = arith.cmpi eq, %26, %50 : vector<1x128xi32>
    %cst_29 = arith.constant 0.000000e+00 : f32
    %52 = vector.shape_cast %51 : vector<1x128xi1> to vector<1x128xi1>
    %53 = vector.broadcast %52 : vector<1x128xi1> to vector<16x128xi1>
    %54 = vector.shape_cast %49 : vector<16x1xf32> to vector<16x1xf32>
    %55 = vector.broadcast %54 : vector<16x1xf32> to vector<16x128xf32>
    %56 = vector.broadcast %cst_29 : f32 to vector<16x128xf32>
    %57 = arith.select %53, %55, %56 : vector<16x128xi1>, vector<16x128xf32>
    %58 = arith.addf %42, %57 : vector<16x128xf32>
    %c0_30 = arith.constant 0 : index
    %c0_31 = arith.constant 0 : index
    %c0_32 = arith.constant 0 : index
    %59 = vector.load %arg5[%c0_30, %c0_31, %c0_32] : memref<1x16x1xf32, #tpu.memory_space<vmem>>, vector<1x16x1xf32>
    %60 = vector.shape_cast %59 : vector<1x16x1xf32> to vector<16x1xf32>
    %61 = vector.broadcast %60 : vector<16x1xf32> to vector<16x128xf32>
    %62 = arith.addf %58, %61 : vector<16x128xf32>
    %cst_33 = arith.constant 0.000000e+00 : f32
    %63 = vector.broadcast %cst_33 : f32 to vector<16x128xf32>
    %64 = arith.maximumf %62, %63 : vector<16x128xf32>
    %cst_34 = arith.constant dense<0.000000e+00> : vector<128xf32>
    %65 = vector.multi_reduction <add>, %64, %cst_34 [0] : vector<16x128xf32> to vector<128xf32>
    %66 = vector.shape_cast %65 : vector<128xf32> to vector<1x128xf32>
    %cst_35 = arith.constant 1.600000e+01 : f32
    %67 = vector.broadcast %cst_35 : f32 to vector<1x128xf32>
    %68 = arith.divf %66, %67 : vector<1x128xf32>
    %69 = vector.broadcast %68 : vector<1x128xf32> to vector<16x128xf32>
    %70 = arith.subf %64, %69 : vector<16x128xf32>
    %71 = arith.mulf %70, %70 : vector<16x128xf32>
    %cst_36 = arith.constant dense<0.000000e+00> : vector<128xf32>
    %72 = vector.multi_reduction <add>, %71, %cst_36 [0] : vector<16x128xf32> to vector<128xf32>
    %73 = vector.shape_cast %72 : vector<128xf32> to vector<1x128xf32>
    %cst_37 = arith.constant 1.600000e+01 : f32
    %74 = vector.broadcast %cst_37 : f32 to vector<1x128xf32>
    %75 = arith.divf %73, %74 : vector<1x128xf32>
    %cst_38 = arith.constant 9.99999974E-6 : f32
    %76 = vector.broadcast %cst_38 : f32 to vector<1x128xf32>
    %77 = arith.addf %75, %76 : vector<1x128xf32>
    %78 = math.rsqrt %77 : vector<1x128xf32>
    %79 = vector.broadcast %78 : vector<1x128xf32> to vector<16x128xf32>
    %80 = arith.mulf %70, %79 : vector<16x128xf32>
    %c0_39 = arith.constant 0 : index
    %c0_40 = arith.constant 0 : index
    %81 = vector.load %arg6[%c0_39, %c0_40] : memref<16x1xf32, #tpu.memory_space<vmem>>, vector<16x1xf32>
    %82 = vector.broadcast %81 : vector<16x1xf32> to vector<16x128xf32>
    %83 = arith.mulf %80, %82 : vector<16x128xf32>
    %c0_41 = arith.constant 0 : index
    %c0_42 = arith.constant 0 : index
    %84 = vector.load %arg7[%c0_41, %c0_42] : memref<16x1xf32, #tpu.memory_space<vmem>>, vector<16x1xf32>
    %85 = vector.broadcast %84 : vector<16x1xf32> to vector<16x128xf32>
    %86 = arith.addf %83, %85 : vector<16x128xf32>
    %c0_43 = arith.constant 0 : index
    %c0_44 = arith.constant 0 : index
    %c0_45 = arith.constant 0 : index
    %87 = vector.load %arg8[%c0_43, %c0_44, %c0_45] : memref<1x16x128xf32, #tpu.memory_space<vmem>>, vector<1x16x128xf32>
    %88 = vector.shape_cast %87 : vector<1x16x128xf32> to vector<16x128xf32>
    %89 = vector.shape_cast %86 : vector<16x128xf32> to vector<1x16x128xf32>
    tpu.vector_store %arg8[%c0_43, %c0_44, %c0_45], %89 {strides = array<i32>} : memref<1x16x128xf32, #tpu.memory_space<vmem>>, vector<1x16x128xf32>,
    return
  }
  func.func @transform_0(%arg0: i32, %arg1: i32) -> (i32, i32, i32) {
    %c0_i32 = arith.constant 0 : i32
    %c0_i32_0 = arith.constant 0 : i32
    return %arg0, %c0_i32, %arg1 : i32, i32, i32
  }
  func.func @transform_1(%arg0: i32, %arg1: i32) -> (i32, i32, i32, i32) {
    %c0_i32 = arith.constant 0 : i32
    %c0_i32_0 = arith.constant 0 : i32
    %c0_i32_1 = arith.constant 0 : i32
    return %arg0, %arg1, %c0_i32, %c0_i32_0 : i32, i32, i32, i32
  }
  func.func @transform_2(%arg0: i32, %arg1: i32) -> (i32, i32, i32) {
    %c0_i32 = arith.constant 0 : i32
    %c0_i32_0 = arith.constant 0 : i32
    %c0_i32_1 = arith.constant 0 : i32
    %c0_i32_2 = arith.constant 0 : i32
    return %c0_i32, %c0_i32_0, %c0_i32_1 : i32, i32, i32
  }
  func.func @transform_3(%arg0: i32, %arg1: i32) -> (i32, i32, i32) {
    %c0_i32 = arith.constant 0 : i32
    %c0_i32_0 = arith.constant 0 : i32
    %c0_i32_1 = arith.constant 0 : i32
    return %arg0, %c0_i32, %c0_i32_0 : i32, i32, i32
  }
  func.func @transform_4(%arg0: i32, %arg1: i32) -> (i32, i32) {
    %c0_i32 = arith.constant 0 : i32
    %c0_i32_0 = arith.constant 0 : i32
    %c0_i32_1 = arith.constant 0 : i32
    return %c0_i32, %c0_i32_0 : i32, i32
  }
  func.func @transform_5(%arg0: i32, %arg1: i32) -> (i32, i32) {
    %c0_i32 = arith.constant 0 : i32
    %c0_i32_0 = arith.constant 0 : i32
    %c0_i32_1 = arith.constant 0 : i32
    return %c0_i32, %c0_i32_0 : i32, i32
  }
  func.func @transform_6(%arg0: i32, %arg1: i32) -> (i32, i32, i32) {
    %c0_i32 = arith.constant 0 : i32
    %c0_i32_0 = arith.constant 0 : i32
    return %arg0, %c0_i32, %arg1 : i32, i32, i32
  }
}

</mosaic_0001>

<bundles_post_ra>
// kernel: tpu_custom_call.1
= control target key start
LH: loop header
LB: loop body
LE: loop exit
PB: predicated region body
PF: predicated region fallthrough
CT: control target
= control target key end

     0   :  { %s1472_s0 = inlined_call_operand.hbm [shape: f32[2,16,384], index: 0, kind: input, shape index: {}]   ;;  %s1473_s1 = inlined_call_operand.vmem [shape: f32[2,3,2,16], index: 1, kind: input, shape index: {}]   ;;  %s1474_s2 = inlined_call_operand.vmem [shape: f32[3,16,16], index: 2, kind: input, shape index: {}]   ;;  %s1475_s3 = inlined_call_operand.vmem [shape: f32[2,16,1], index: 3, kind: input, shape index: {}]   ;;  %s1476_s4 = inlined_call_operand.vmem [shape: f32[16,1], index: 4, kind: input, shape index: {}]   ;;  %s1477_s5 = inlined_call_operand.vmem [shape: f32[16,1], index: 5, kind: input, shape index: {}]   ;;  %s1478_s6 = inlined_call_operand.hbm [shape: f32[2,16,384], index: 6, kind: output, shape index: {}]  }
   0x1   :  { %1483 = sst [smem:[#allocation10_spill]] %s1472_s0 }
   0x2   :  { %11 = vsyncpa [#allocation3], 0 }
   0x3   :  { %13 = vsyncpa [#allocation3 + $0x1], 0 }
   0x4   :  { %14 = vsyncpa [#allocation4], 0 }
   0x5   :  { %16 = vsyncpa [#allocation4 + $0x1], 0  ;;  %s1217_s21 = smov 0   ;;  %s1219_s22 = smov 0  }
   0x6   :  { %s1221_s23 = smov 0   ;;  %s1223_s24 = smov 0  }
   0x7   :  { %s1225_s25 = smov 0   ;;  %s1227_s26 = smov 0  }
   0x8   :  { %s1229_s27 = smov 0   ;;  %s1231_s28 = smov 0  }
   0x9 LB: > { %1484 = sst [smem:[#allocation8_spill]] %s1141_s21  ;;  %s853_s29 = sadd.s32 4294967295, %s1169_s28   ;;  %s1169_s28 = sphi %s1231_s28, %s22_s28   ;;  %s1165_s27 = sphi %s1229_s27, %s1503_s27   ;;  %s1161_s26 = sphi %s1227_s26, %s1502_s26   ;;  %s1157_s25 = sphi %s1225_s25, %s1501_s25   ;;  %s1153_s24 = sphi %s1223_s24, %s1500_s24   ;;  %s1149_s23 = sphi %s1221_s23, %s1499_s23   ;;  %s1145_s22 = sphi %s1219_s22, %s1498_s22   ;;  %s1141_s21 = sphi %s1217_s21, %s1497_s21  }
   0xa   : > { %s854_s30 = sadd.s32 4294967294, %s1169_s28   ;;  %s31_s7 = sadd.s32 1, %s1161_s26 }
   0xb   : > { %s34_s8 = sadd.s32 1, %s1165_s27  ;;  %p32_p0 = scmp.ge.s32.totalorder %s31_s7, 3 }
   0xc   : > { %s43_s9 = sadd.s32 1, %s1149_s23  ;;  %p50_p1 = scmp.ne.s32.totalorder %s1149_s23, %s1145_s22 }
   0xd   : > { %p51_p2 = scmp.eq.s32.totalorder %s1169_s28, 0  ;;  %s1505_s7 = smov (%p32_p0, %s31_s7), 0 }
   0xe   : > { %1485 = sst [smem:[#allocation9_spill]] %s1505_s7  ;;  %s1507_s8 = smov (!%p32_p0, %s34_s8), %s1165_s27 }
   0xf   : > { %s39_s10 = ssub.s32 %s1161_s26, %s1505_s7  ;;  %p1270_p3 = por %p51_p2, %p50_p1 }
  0x10   : > { %p36_p4 = scmp.ge.s32.totalorder %s1507_s8, 2  ;;  %p56_p5 = scmp.ne.s32.totalorder %s1145_s22, %s1141_s21 }
  0x11   : > { %p57_p6 = scmp.eq.s32.totalorder %s853_s29, 0  ;;  %p199_p7 = scmp.eq.s32.totalorder %s853_s29, 5 }
  0x12   : > { %s1509_s8 = smov (%p36_p4, %s1507_s8), 0  ;;  %p205_p10 = scmp.eq.s32.totalorder %s854_s30, 5 }
  0x13   : > { %p1278_p8 = por %p57_p6, %p56_p5  ;;  %p1282_p9 = por %p199_p7, %p50_p1 }
  0x14   : > { %s38_s14 = ssub.s32 %s1165_s27, %s1509_s8  ;;  %p1288_p12 = por %p205_p10, %p56_p5 }
  0x15   : > { %s1488_s13 = scalar_select %p1282_p9, 1, 0 }
  0x16   : > { %s40_s15 = sor.u32 %s39_s10, %s38_s14  ;;  %p952_p13 = scmp.lt.s32.totalorder %s1169_s28, 6 }
  0x17   : > { %p41_p11 = scmp.eq.s32.totalorder %s40_s15, 0  ;;  %s234_s17 = sand.u32 1, %s1149_s23  }
  0x18   : > { %s1489_s16 = scalar_select %p1288_p12, 1, 0 }
  0x19   : > { %s1295_s18 = scalar_select %p41_p11, %s1149_s23, %s43_s9  }
  0x1a   : > { %s857_s19 = sshll.u32 %s234_s17, 4  ;;  %s937_s20 = smul.u32 6, %s1165_s27 }
  0x1b   : > { %s238_s29 = scalar_lea.vmem [#allocation2], %s857_s19  ;;  %p1300_p0 = pnand %p952_p13, %p1270_p3 }
  0x1c   : > { %s246_s7 = sshll.u32 %s238_s29, 4  ;;  %s243_s30 = sadd.s32 %s1161_s26, %s937_s20  ;;  %s1305_s7 = int_to_ptr.vmem [resolvable:$true] %s246_s7 }
  0x1d   : > { %s858_s10 = sshll.u32 %s243_s30, 7  ;;  %s1491_s0 = sld [smem:[#allocation10_spill]] }
  0x1e   : > { %s1312_s11 = scalar_lea.sflag [#allocation3], %s234_s17  ;;  %p1043_p2 = pneg %p1300_p0 }
  0x23   : > { %s1310_s9 = scalar_lea.hbm %s1491_s0, %s858_s10  ;;  %s1046_s30 = scalar_lea.hbm %s1491_s0, 1536 }
  0x24   : > { %s1041_s19 = scalar_lea.hbm %s1310_s9, 256  ;;  %p1047_p5 = scmp.lt.u32.totalorder %s1310_s9, %s1491_s0 }
  0x25   : > { %p1042_p1 = scmp.ne.s32.totalorder %s1310_s9, %s1041_s19  ;;  %p1048_p6 = scmp.lt.u32.totalorder %s1046_s30, %s1041_s19 }
  0x26   : > { %p1050_p10 = scmp.lt.u32.totalorder %s1041_s19, %s1310_s9 }
  0x27   : > { %p1044_p3 = pnand %p1043_p2, %p1042_p1  ;;  %p1049_p7 = por %p1048_p6, %p1047_p5 }
  0x29   : > { %p1045_p4 = pneg %p1044_p3  ;;  %p1051_p11 = por %p1050_p10, %p1049_p7 }
  0x2b   : > { %p1052_p13 = pnand %p1051_p11, %p1045_p4 }
  0x2d   : > { %1055 = shalt.err (!%p1052_p13)
}
  0x2e   : > { %s1056_s17 = scalar_lea.vmem %s1305_s7, 256  ;;  %s1171_s15 = smov [#allocation2]  }
  0x2f   : > { %p1057_p1 = scmp.ne.s32.totalorder %s1305_s7, %s1056_s17  ;;  %s1061_s20 = sshll.u32 %s1171_s15, 4  ;;  %s1062_s20 = int_to_ptr.vmem [resolvable:$false] %s1061_s20 }
  0x30   : > { %s1063_s29 = scalar_lea.vmem %s1062_s20, 512  ;;  %p1064_p9 = scmp.lt.s32.totalorder %s1305_s7, %s1062_s20 }
  0x31   : > { %p1059_p3 = pnand %p1057_p1, %p1043_p2  ;;  %p1065_p5 = scmp.lt.s32.totalorder %s1063_s29, %s1056_s17 }
  0x33   : > { %p1060_p12 = pneg %p1059_p3  ;;  %p1066_p6 = por %p1065_p5, %p1064_p9 }
  0x35   : > { %p1067_p7 = pnand %p1066_p6, %p1060_p12 }
  0x37   : > { %1070 = shalt.err (!%p1067_p7)
}
  0x38   : > { %s1172_s19 = smov 384   ;;  %s1173_s30 = smov 128  }
  0x39   : > { %s1174_s10 = smov 8   ;;  %p859_p2 = scmp.ge.s32.totalorder %s1169_s28, 1 }
  0x3a   : > { %947 = dma.hbm_to_vmem [thread:$0]  (!%p1300_p0), %s1310_s9, 256, %s1305_s7, %s1312_s11, %s1172_s19, %s1173_s30, %s1174_s10  }
  0x3b   : > { %p273_p4 = scmp.lt.s32.totalorder %s1169_s28, 7 }
  0x3d   : > { %p274_p10 = pnand %p859_p2, %p273_p4 }
  0x3e   : > { %s1343_s14 = sand.u32 (!%p274_p10), 1, %s1145_s22  }
  0x3f   : > { %277 = sbr.rel (%p274_p10) target bundleno = 495 (0x1ef), region = 44  ;;  %s1482_s17 = sshll.u32 (!%p274_p10), %s1343_s14, 4 }
  0x40   : > { %s280_s15 = scalar_lea.sflag (!%p274_p10), [#allocation3], %s1343_s14  ;;  %s283_s20 = scalar_lea.vmem (!%p274_p10), [#allocation2], %s1482_s17 }
  0x46   : > { %1132 = dma.done.wait (%p1278_p8), %s280_s15, 256  }
  0x47   : > { %1134 = vsyncadd (%p1278_p8), %s280_s15, 4294967040  ;;  %vm354_vm0 = vcmask 130048   ;;  %v343_v0 = vlaneseq  ;;  %p325_p9 = scmp.lt.s32.totalorder %s1157_s25, 1  ;;  %p327_p12 = scmp.lt.s32.totalorder %s1153_s24, 2  ;;  %v338_v1 = vld [vmem:[%s283_s20] sm:$0xff]  ;;  %v339_v2 = vld [vmem:[%s283_s20 + $0x8] sm:$0xff] }
  0x48   : > { %v865_v3 = vld [vmem:[%s1474_s2 + $0x10] sm:$0xff]  ;;  %v1027_v4 = vpack.i.bf16 %v339_v2, %v338_v1  ;;  %v923_v5 = vpack.c.bf16 %v339_v2, %v338_v1  ;;  %v352_v6 = vld [vmem:[%s1474_s2] sm:$0xff]  ;;  %s1175_s19 = smov 1   ;;  %v866_v8 = vld [vmem:[%s1474_s2 + $0x18] sm:$0xff]  ;;  %v1176_v9 = vmov 0   ;;  %s1177_s11 = smov 127  }
  0x49   : > { %907 = vmatprep.mubr.msk.f32.mxu0 %vm354_vm0, %v865_v3  ;;  %s1360_s12 = scalar_select %p325_p9, %s1157_s25, 1  ;;  %v612_v7 = vshrl.u32 %v343_v0, 7  ;;  %900 = vmatprep.mubr.msk.f32.mxu1 %vm354_vm0, %v352_v6  ;;  %v873_v11 = vld [vmem:[%s1474_s2 + $0x20] sm:$0xff]  ;;  %v353_v15 = vld [vmem:[%s1474_s2 + $0x8] sm:$0xff]  ;;  %v344_v32 = vand.u32 127, %v343_v0 }
  0x4a   : > { %s328_s29 = scalar_select %p327_p12, %s1153_s24, 2  ;;  %1028 = vrot.lane.b32.xlu0 %v1027_v4, %s1175_s19  ;;  %924 = vmatprep.subr.bf16.mxu0 %v923_v5  ;;  %v874_v20 = vld [vmem:[%s1474_s2 + $0x28] sm:$0xff]  ;;  %v690_v28 = vld [vmem:[%s1476_s4] sm:$0xff] }
  0x4b   : > { %s938_s30 = smul.u32 3, %s1360_s12  ;;  %926 = vmatpush3.bf16.msra.mxu0 %v923_v5  ;;  %1037 = vset.pattern.permute.xlu1 %v1176_v9  ;;  %v613_v10 = vsub.s32 0, %v612_v7  ;;  %v632_v12 = vsub.s32 1, %v612_v7  ;;  %v691_v29 = vld [vmem:[%s1476_s4 + $0x8] sm:$0xff]  ;;  %v704_v31 = vld [vmem:[%s1477_s5] sm:$0xff]  ;;  %vm349_vm1 = vcmp.ge.s32.totalorder %v344_v32, 1 }
  0x4c   : > { %1038 = vset.pattern.permute.xlu0 %v1176_v9  ;;  %v705_v30 = vld [vmem:[%s1477_s5 + $0x8] sm:$0xff]  ;;  %vm918_vm2 = vmpackc.low %vm349_vm1, %vm349_vm1  ;;  %vm521_vm3 = vcmp.lt.s32.totalorder %v344_v32, 127  ;;  %vm623_vm5 = vcmp.eq.s32.totalorder %v344_v32, 0  ;;  %vm642_vm6 = vcmp.eq.s32.totalorder %v344_v32, 127  ;;  %s939_s15 = smul.u32 6, %s1157_s25  ;;  %s1492_s17 = sshll.u32 %s1343_s14, 4 }
  0x4d   : > { %s330_s20 = sadd.s32 %s938_s30, %s328_s29  ;;  %vm928_vm4 = vmpackc.low %vm521_vm3, %vm521_vm3  ;;  %p1493_p0 = scmp.ne.s32.totalorder %s1488_s13, 0 }
  0x4e   : > { %s862_s9 = sshll.u32 %s330_s20, 1  ;;  %1033 = vrot.lane.b32.xlu0 %v1027_v4, %s1177_s11  ;;  %908 = vmatmul.mubr.msk.f32.vlgmr.msra.gmra.mrb[0].mxu0 %vm354_vm0, %v866_v8  ;;  %s324_s20 = scalar_lea.vmem [#allocation5], %s1492_s17 }
  0x4f   : > { %s332_s0 = scalar_lea.vmem %s1473_s1, %s862_s9  ;;  %914 = vmatprep.mubr.msk.f32.mxu0 %vm354_vm0, %v873_v11  ;;  %s721_s11 = scalar_lea.sflag [#allocation4], %s1343_s14 }
  0x50   : > { %v610_v13 = vld [vmem:[%s332_s0] sm:$0x3]  ;;  %s883_s0 = sshll.u32 %s1360_s12, 4  ;;  %s1178_s12 = smov [#allocation5]  }
  0x51   : > { %v614_v14 = vrot.slane %v610_v13, %v613_v10  ;;  %v633_v18 = vrot.slane %v610_v13, %v632_v12  ;;  %s337_s21 = scalar_lea.vmem %s1475_s3, %s883_s0  ;;  %s732_s0 = sadd.s32 %s1153_s24, %s939_s15 }
  0x52   : > { %v649_v26 = vld [vmem:[%s337_s21] sm:$0xff]  ;;  %v650_v27 = vld [vmem:[%s337_s21 + $0x8] sm:$0xff]  ;;  %s735_s21 = sshll.u32 %s324_s20, 4  ;;  %s880_s7 = sshll.u32 %s732_s0, 7  ;;  %s1413_s21 = int_to_ptr.vmem [resolvable:$true] %s735_s21 }
  0x53   : > { %v615_v16 = vmul.f32 %v614_v14, %v352_v6  ;;  %v616_v17 = vmul.f32 %v614_v14, %v353_v15  ;;  %v635_v22 = vmul.f32 %v874_v20, %v633_v18  ;;  %v634_v24 = vmul.f32 %v873_v11, %v633_v18  ;;  %s1418_s9 = scalar_lea.hbm %s1478_s6, %s880_s7  ;;  %s1071_s19 = scalar_lea.vmem %s1413_s21, 256 }
  0x54   : > { %p1072_p8 = scmp.ne.s32.totalorder %s1413_s21, %s1071_s19  ;;  %s1075_s29 = sshll.u32 %s1178_s12, 4  ;;  %s1076_s29 = int_to_ptr.vmem [resolvable:$false] %s1075_s29 }
  0x55   : > { %v617_v19 = vsel %vm354_vm0, %v615_v16, 0.0  ;;  %v620_v21 = vsel %vm354_vm0, %v616_v17, 0.0  ;;  %v639_v23 = vsel %vm354_vm0, %v635_v22, 0.0  ;;  %v636_v25 = vsel %vm354_vm0, %v634_v24, 0.0  ;;  %s1077_s30 = scalar_lea.vmem %s1076_s29, 512  ;;  %p1078_p1 = scmp.lt.s32.totalorder %s1413_s21, %s1076_s29 }
  0x56   : > { %618 = vadd.xlane.f32.xlu1 %v617_v19  ;;  %p1073_p11 = pnand %p1072_p8, %p1493_p0  ;;  %p1079_p3 = scmp.lt.s32.totalorder %s1077_s30, %s1071_s19 }
  0x58   : > { %p1074_p13 = pneg %p1073_p11  ;;  %p1080_p5 = por %p1079_p3, %p1078_p1 }
  0x5a   : > { %621 = vadd.xlane.f32.xlu1 %v620_v21  ;;  %p1081_p6 = pnand %p1080_p5, %p1074_p13 }
  0x5e   : > { %640 = vadd.xlane.f32.xlu1 %v639_v23 }
  0x6d   : > { %637 = vadd.xlane.f32.xlu0 %v636_v25 }
  0x6f   : > { %653 = vperm.xlu1 %1037, %v649_v26  }
  0x73   : > { %658 = vperm.xlu1 %1037, %v650_v27  }
  0x77   : > { %694 = vperm.xlu1 %1037, %v690_v28  }
  0x7b   : > { %699 = vperm.xlu1 %1037, %v691_v29  }
  0x7f   : > { %713 = vperm.xlu1 %1037, %v705_v30  }
  0x83   : > { %708 = vperm.xlu0 %1038, %v704_v31  }
  0xbc   : > { %v1029_v33 = vpop.permute.xlu0 %1028 }
  0xbd   : > { %v1031_v34 = vunpack.i.h.bf16 %v1029_v33  ;;  %v1030_v35 = vunpack.i.l.bf16 %v1029_v33 }
  0xbf   : > { %v917_v36 = vpack.c.bf16 %v1031_v34, %v1030_v35 }
  0xc0   : > { %v1034_v37 = vpop.permute.xlu0 %1033 }
  0xc1   : > { %v1036_v38 = vunpack.i.h.bf16 %v1034_v37  ;;  %v1035_v39 = vunpack.i.l.bf16 %v1034_v37  ;;  %919 = vmatprep.subr.msk.bf16.mxu1 %vm918_vm2, %v917_v36 }
  0xc2   : > { %922 = vmatpush3.bf16.msk.msra.mxu1 %vm918_vm2, %v917_v36 }
  0xc3   : > { %v927_v40 = vpack.c.bf16 %v1036_v38, %v1035_v39 }
  0xc5   : > { %929 = vmatprep.subr.msk.bf16.mxu0 %vm928_vm4, %v927_v40  ;;  %901 = vmatmul.mubr.msk.f32.vlgmr.msra.gmra.mrb[0].mxu1 %vm354_vm0, %v353_v15 }
  0xc6   : > { %932 = vmatpush3.bf16.msk.msra.mxu0 %vm928_vm4, %v927_v40 }
  0xc9   : > { %915 = vmatmul.mubr.msk.f32.vlgmr.msra.gmra.mrb[0].mxu0 %vm354_vm0, %v874_v20 }
  0xe3   : > { %v619_v41 = vpop.xlane.xlu1 %618 }
  0xe4   : > { %v626_v53 = vsel %vm623_vm5, %v619_v41, 0.0 }
  0xe7   : > { %v622_v42 = vpop.xlane.xlu1 %621 }
  0xe8   : > { %v627_v51 = vsel %vm623_vm5, %v622_v42, 0.0 }
  0xeb   : > { %v641_v43 = vpop.xlane.xlu1 %640 }
  0xec   : > { %v646_v56 = vsel %vm642_vm6, %v641_v43, 0.0 }
  0xef   : > { %v654_v46 = vpop.permute.xlu1 %653 }
  0xf3   : > { %v659_v59 = vpop.permute.xlu1 %658 }
  0xf7   : > { %v695_v22 = vpop.permute.xlu1 %694 }
  0xfa   : > { %v638_v48 = vpop.xlane.xlu0 %637 }
  0xfb   : > { %v645_v55 = vsel %vm642_vm6, %v638_v48, 0.0  ;;  %v700_v23 = vpop.permute.xlu1 %699 }
  0xff   : > { %v714_v30 = vpop.permute.xlu1 %713 }
 0x102   : > { %v709_v27 = vpop.permute.xlu0 %708 }
 0x198   : > { %v902_v44 = vpop.f32.mrb[0].mxu1 }
 0x199   : > { %v427_v45 = vpop.f32.mrb[1].mxu1 }
 0x19c   : > { %v916_v47 = vpop.f32.mrb[0].mxu0 }
 0x19d   : > { %v933_v49 = vadd.f32 %v916_v47, %v902_v44  ;;  %v599_v50 = vpop.f32.mrb[1].mxu0 }
 0x19e   : > { %v934_v52 = vadd.f32 %v599_v50, %v427_v45 }
 0x19f   : > { %v629_v54 = vadd.f32 %v933_v49, %v627_v51 }
 0x1a0   : > { %v628_v57 = vadd.f32 %v934_v52, %v626_v53 }
 0x1a1   : > { %v648_v58 = vadd.f32 %v646_v56, %v629_v54 }
 0x1a2   : > { %v647_v60 = vadd.f32 %v645_v55, %v628_v57 }
 0x1a3   : > { %v662_v61 = vadd.f32 %v659_v59, %v648_v58 }
 0x1a4   : > { %v661_v62 = vadd.f32 %v654_v46, %v647_v60 }
 0x1a5   : > { %v664_v63 = vmax.f32 %v662_v61, 0.0 }
 0x1a6   : > { %v663_v0 = vmax.f32 %v661_v62, 0.0 }
 0x1a8   : > { %v665_v1 = vadd.f32 %v664_v63, %v663_v0 }
 0x1aa   : > { %v666_v2 = vrot.slane %v665_v1, 4 }
 0x1ac   : > { %v667_v3 = vadd.f32 %v666_v2, %v665_v1 }
 0x1ae   : > { %v668_v4 = vrot.slane %v667_v3, 2 }
 0x1b0   : > { %v669_v5 = vadd.f32 %v668_v4, %v667_v3 }
 0x1b2   : > { %v670_v6 = vrot.slane %v669_v5, 1 }
 0x1b4   : > { %v671_v7 = vadd.f32 %v670_v6, %v669_v5 }
 0x1b6   : > { %v673_v8 = vmul.f32 0.0625, %v671_v7 }
 0x1b8   : > { %v674_v9 = vsub.f32 %v663_v0, %v673_v8  ;;  %v675_v10 = vsub.f32 %v664_v63, %v673_v8 }
 0x1ba   : > { %v676_v11 = vmul.f32 %v674_v9, %v674_v9  ;;  %v677_v12 = vmul.f32 %v675_v10, %v675_v10 }
 0x1bc   : > { %v678_v13 = vadd.f32 %v677_v12, %v676_v11 }
 0x1be   : > { %v679_v14 = vrot.slane %v678_v13, 4 }
 0x1c0   : > { %v680_v15 = vadd.f32 %v679_v14, %v678_v13 }
 0x1c2   : > { %v681_v16 = vrot.slane %v680_v15, 2 }
 0x1c4   : > { %v682_v17 = vadd.f32 %v681_v16, %v680_v15 }
 0x1c6   : > { %v683_v18 = vrot.slane %v682_v17, 1 }
 0x1c8   : > { %v684_v19 = vadd.f32 %v683_v18, %v682_v17 }
 0x1ca   : > { %v685_v20 = vmul.f32 0.0625, %v684_v19 }
 0x1cc   : > { %v686_v21 = vadd.f32 1e-05, %v685_v20 }
 0x1ce   : > { %1039 = vrsqrt.f32 %v686_v21 }
 0x1d8   : > { %v1040_v24 = vpop.eup %1039 }
 0x1d9   : > { %v689_v25 = vmul.f32 %v1040_v24, %v675_v10  ;;  %v688_v26 = vmul.f32 %v1040_v24, %v674_v9 }
 0x1db   : > { %v703_v28 = vmul.f32 %v700_v23, %v689_v25  ;;  %v702_v29 = vmul.f32 %v695_v22, %v688_v26 }
 0x1dd   : > { %v717_v31 = vadd.f32 %v714_v30, %v703_v28  ;;  %v716_v32 = vadd.f32 %v709_v27, %v702_v29 }
 0x1df   : > { %719 = vst [vmem:[%s324_s20 + $0x8] sm:$0xff] %v717_v31  ;;  %718 = vst [vmem:[%s324_s20] sm:$0xff] %v716_v32 }
 0x1e0   : > { %1084 = shalt.err (!%p1081_p6)
}
 0x1e1   : > { %s1085_s10 = scalar_lea.hbm %s1418_s9, 256  ;;  %s1089_s17 = scalar_lea.hbm %s1478_s6, 1536 }
 0x1e2   : > { %p1086_p7 = scmp.ne.s32.totalorder %s1418_s9, %s1085_s10  ;;  %p1090_p10 = scmp.lt.u32.totalorder %s1418_s9, %s1478_s6 }
 0x1e3   : > { %p1091_p9 = scmp.lt.u32.totalorder %s1089_s17, %s1085_s10  ;;  %p1093_p8 = scmp.lt.u32.totalorder %s1085_s10, %s1418_s9 }
 0x1e4   : > { %p1087_p2 = pnand %p1086_p7, %p1493_p0 }
 0x1e5   : > { %p1092_p12 = por %p1091_p9, %p1090_p10 }
 0x1e6   : > { %p1088_p4 = pneg %p1087_p2 }
 0x1e7   : > { %p1094_p11 = por %p1093_p8, %p1092_p12 }
 0x1e9   : > { %p1095_p13 = pnand %p1094_p11, %p1088_p4 }
 0x1eb   : > { %1098 = shalt.err (!%p1095_p13)
}
 0x1ec   : > { %s1179_s25 = smov 128   ;;  %s1180_s24 = smov 384  }
 0x1ed   : > { %s1181_s19 = smov 8  }
 0x1ee   : > { %942 = dma.vmem_to_hbm [thread:$0]  (%p1493_p0), %s1413_s21, 256, %s1418_s9, %s721_s11, %s1179_s25, %s1180_s24, %s1181_s19  }
 0x1ef PF: > { %s1494_s12 = sld [smem:[#allocation8_spill]]  ;;  %p953_p1 = scmp.ge.s32.totalorder %s1169_s28, 2 }
 0x1f0   : > { %p1495_p3 = scmp.ne.s32.totalorder %s1489_s16, 0 }
 0x1f2   : > { %p949_p5 = pnand %p953_p1, %p1495_p3 }
 0x1f5   : > { %s750_s29 = sand.u32 1, %s1494_s12  }
 0x1f6   : > { %s751_s30 = scalar_lea.sflag [#allocation4], %s750_s29 }
 0x1f7   : > { %1136 = dma.done.wait (!%p949_p5), %s751_s30, 256  }
 0x1f8   : > { %1138 = vsyncadd (!%p949_p5), %s751_s30, 4294967040  ;;  %s22_s28 = sadd.s32 1, %s1169_s28   ;;  %s1496_s13 = sld [smem:[#allocation9_spill]] }
 0x1f9   : > { %p19_p6 = scmp.ge.s32.totalorder %s22_s28, 8   ;;  %s1497_s21 = smov %s1145_s22 }
 0x1fa   : > { %s1498_s22 = smov %s1149_s23  ;;  %s1499_s23 = smov %s1295_s18 }
 0x1fb   : > { %s1500_s24 = smov %s1161_s26  ;;  %s1501_s25 = smov %s1165_s27 }
 0x1fc   : > { %s1503_s27 = smov %s1509_s8  ;;  %21 = sbr.rel (!%p19_p6) target bundleno = 9 (0x9), region = 97 }
 0x1fe   : > { %s1502_s26 = smov %s1496_s13 }
 0x203   :  { %756 = vsyncpa [#allocation3], 1 }
 0x204   :  { %758 = vsyncpa [#allocation3 + $0x1], 1 }
 0x205   :  { %759 = vsyncpa [#allocation4], 1 }
 0x206   :  { %761 = vsyncpa [#allocation4 + $0x1], 1 }

</bundles_post_ra>
